<compile_context>
chip_gen: v7x
topology: tpu7x:2x2x1
jax: 0.10.0
libtpu: 0.0.40
codegen_flags: <defaults>
</compile_context>

<pallas_src>
import math

import jax
import jax.numpy as jnp
from jax.experimental import pallas as pl
from jax.experimental.pallas import tpu as pltpu


def _sinusoidal_pe(length, dim):
    """Standard sinusoidal position encoding (PositionEncoding applied to zeros)."""
    pos = jnp.arange(length, dtype=jnp.float32)[:, None]
    i = jnp.arange(dim // 2, dtype=jnp.float32)[None, :]
    inv_freq = jnp.exp(-(2.0 * i / dim) * jnp.log(10000.0))
    ang = pos * inv_freq
    pe = jnp.zeros((length, dim), jnp.float32)
    pe = pe.at[:, 0::2].set(jnp.sin(ang))
    pe = pe.at[:, 1::2].set(jnp.cos(ang))
    return pe


def _layernorm(x, g, b, eps=1e-5):
    mu = jnp.mean(x, axis=-1, keepdims=True)
    var = jnp.mean((x - mu) ** 2, axis=-1, keepdims=True)
    return (x - mu) * jax.lax.rsqrt(var + eps) * g + b


def _make_kernel(num_heads, lq_pad, batch_block):
    bf16 = jnp.bfloat16
    f32 = jnp.float32

    def kernel(x_ref, a_ref, qres_ref, v_ref, wo_ref, bo_ref,
               g1_ref, be1_ref,
               w1_ref, b1_ref, w2_ref, b2_ref,
               g2_ref, be2_ref,
               out_ref):
        # ---- batch-invariant operands: loaded ONCE per grid step (hoisted) ----
        A2 = a_ref[...]            # (Hh*Lqp, E) bf16  == (q/sqrt(d)) @ W_k, heads stacked on M
        q_res = qres_ref[...]      # (Lqp, E)    f32   residual (query_project output)
        v_heads = v_ref[...]       # (Hh, Lk, d) bf16
        wo_heads = wo_ref[...]     # (Hh, d, E)  bf16
        bo = bo_ref[...]           # (1, E)      f32
        g1, be1 = g1_ref[...], be1_ref[...]
        w1, b1 = w1_ref[...], b1_ref[...]
        w2, b2 = w2_ref[...], b2_ref[...]
        g2, be2 = g2_ref[...], be2_ref[...]

        def one_batch(i):
            xb = x_ref[i]          # (E, Lk) bf16 -- feature map of one batch element (== key^T)

            # scores for ALL heads in one K=E matmul (heads stacked on the M dim)
            s = jnp.dot(A2, xb, preferred_element_type=f32)        # (Hh*Lqp, Lk) f32
            s = s - jnp.max(s, axis=-1, keepdims=True)
            p = jnp.exp(s)
            denom = jnp.sum(p, axis=-1, keepdims=True)
            p = (p * pl.reciprocal(denom, approx=True)).astype(bf16)   # EUP divide

            # per-head context + fused output projection (accumulate into one (Lqp, E))
            attn = None
            for h in range(num_heads):
                ph = p[h * lq_pad:(h + 1) * lq_pad, :]              # aligned static slice
                ctx = jnp.dot(ph, v_heads[h], preferred_element_type=f32)          # (Lqp, d)
                part = jnp.dot(ctx.astype(bf16), wo_heads[h],
                               preferred_element_type=f32)                          # (Lqp, E)
                attn = part if attn is None else attn + part
            attn = attn + bo

            # residual + LayerNorm 1 (f32)
            out1 = _layernorm(attn + q_res, g1, be1)

            # FFN: Conv1d(kernel_size=1) == per-position linear, ReLU in between
            h1 = jnp.dot(out1.astype(bf16), w1, preferred_element_type=f32) + b1
            h1 = jnp.maximum(h1, 0.0)
            ffn = jnp.dot(h1.astype(bf16), w2, preferred_element_type=f32) + b2

            # residual + LayerNorm 2 (f32)
            return _layernorm(out1 + ffn, g2, be2)

        if batch_block == 1:
            out_ref[0] = one_batch(0).astype(out_ref.dtype)
        else:
            # fori_loop (not a static unroll) keeps only one iteration's
            # intermediates live -> no vreg blow-up for batch_block > 1.
            def body(i, carry):
                out_ref[i] = one_batch(i).astype(out_ref.dtype)
                return carry
            jax.lax.fori_loop(0, batch_block, body, 0)

    return kernel


def _auto_batch_block(B):
    # amortize per-grid-step overhead, but keep >= 2 grid steps so both
    # v7x TensorCores get work on the "parallel" axis.
    for bb in (4, 3, 2):
        if B % bb == 0 and B // bb >= 2:
            return bb
    return 1


def object_query_attention_forward(x, params, *, num_heads, query_len,
                                   batch_block=None, transpose_output=True,
                                   out_dtype=jnp.float32):
    """Forward pass of ObjectQueryAttentionLayer.

    x: (B, E, H, W) feature map.
    Returns (Lq, B, E) (PyTorch module convention) if transpose_output, else
    (B, Lq, E) (what AttentionalDecoder consumes next; skips one transpose).
    out_dtype=jnp.bfloat16 halves output writeback if the downstream bmm tolerates it.
    """
    B, E, H, W = x.shape
    Lk = H * W
    Lq = query_len
    assert E % num_heads == 0
    d = E // num_heads

    if batch_block is None:
        batch_block = _auto_batch_block(B)
    assert B % batch_block == 0

    # pad query length to a sublane multiple; rows are independent through
    # attention / LN / FFN, so padded rows are exact garbage we slice off.
    Lqp = pl.cdiv(Lq, 8) * 8

    bf16 = jnp.bfloat16
    f32 = jnp.float32

    # free reshape (no HBM transpose); bf16 halves the per-step key DMA
    x_flat = x.reshape(B, E, Lk).astype(bf16)

    # ---- batch-invariant precompute (done once, in the XLA wrapper) ----
    pe_q = _sinusoidal_pe(Lq, E)
    pe_k = _sinusoidal_pe(Lk, E)   # the module builds its value branch from key_pe(zeros)
    q_res = pe_q @ params["w_qproj"].T + params["b_qproj"]   # query_project output (residual)
    v_in = pe_k @ params["w_vproj"].T + params["b_vproj"]    # value_project output
    q = q_res @ params["w_q"].T + params["b_q"]              # MHA q in-projection
    v = v_in @ params["w_v"].T + params["b_v"]               # MHA v in-projection
    scale = 1.0 / math.sqrt(d)

    # Fold W_k into the (batch-invariant) scaled queries.  The key bias b_k
    # only shifts logits per query row and cancels in the softmax -> dropped (exact).
    q_heads = (q * scale).reshape(Lq, num_heads, d).transpose(1, 0, 2)     # (Hh, Lq, d) f32
    wk_heads = params["w_k"].reshape(num_heads, d, E)                      # (Hh, d, E)
    A = jnp.einsum('hqd,hde->hqe', q_heads, wk_heads)                      # (Hh, Lq, E) f32

    if Lqp != Lq:
        A = jnp.pad(A, ((0, 0), (0, Lqp - Lq), (0, 0)))
        q_res = jnp.pad(q_res, ((0, Lqp - Lq), (0, 0)))

    A2 = A.reshape(num_heads * Lqp, E).astype(bf16)                        # heads stacked on M
    v_heads = v.reshape(Lk, num_heads, d).transpose(1, 0, 2).astype(bf16)  # (Hh, Lk, d)
    wo_heads = params["w_o"].T.reshape(num_heads, d, E).astype(bf16)       # (Hh, d, E)

    F = params["w_ffn1"].shape[0]

    args = (
        x_flat,                                                   # (B, E, Lk) bf16
        A2,                                                       # (Hh*Lqp, E) bf16
        q_res.astype(f32),                                        # (Lqp, E)
        v_heads,                                                  # (Hh, Lk, d) bf16
        wo_heads,                                                 # (Hh, d, E) bf16
        params["b_o"].reshape(1, E).astype(f32),
        params["ln1_g"].reshape(1, E).astype(f32),
        params["ln1_b"].reshape(1, E).astype(f32),
        params["w_ffn1"].T.astype(bf16),                          # (E, F)
        params["b_ffn1"].reshape(1, -1).astype(f32),              # (1, F)
        params["w_ffn2"].T.astype(bf16),                          # (F, E)
        params["b_ffn2"].reshape(1, E).astype(f32),
        params["ln2_g"].reshape(1, E).astype(f32),
        params["ln2_b"].reshape(1, E).astype(f32),
    )

    def const_spec(a):
        # full-array block, constant index map -> stays resident in VMEM
        return pl.BlockSpec(a.shape, lambda b, nd=a.ndim: (0,) * nd)

    in_specs = [pl.BlockSpec((batch_block, E, Lk), lambda b: (b, 0, 0))]
    in_specs += [const_spec(a) for a in args[1:]]

    # ---- VMEM budget derived from actual buffer sizes (double-buffered) ----
    out_itemsize = jnp.dtype(out_dtype).itemsize
    invariant_bytes = sum(int(a.size) * a.dtype.itemsize for a in args[1:])
    x_block_bytes = batch_block * E * Lk * 2
    out_block_bytes = batch_block * Lqp * E * out_itemsize
    tmp_bytes = (num_heads * Lqp * Lk * (4 + 2)    # scores f32 + probs bf16
                 + Lqp * F * 4                      # FFN hidden
                 + 8 * Lqp * E * 4)                 # attn / out1 / ffn / LN temporaries
    needed = 2 * (invariant_bytes + x_block_bytes + out_block_bytes) + tmp_bytes + (4 << 20)
    vmem_limit = int(min(max(needed, 16 << 20), 64 << 20))   # 64 MiB cap also fits v7x

    kernel = _make_kernel(num_heads, Lqp, batch_block)
    out = pl.pallas_call(
        kernel,
        out_shape=jax.ShapeDtypeStruct((B, Lqp, E), out_dtype),
        grid_spec=pltpu.PrefetchScalarGridSpec(
            num_scalar_prefetch=0,
            grid=(B // batch_block,),
            in_specs=in_specs,
            out_specs=pl.BlockSpec((batch_block, Lqp, E), lambda b: (b, 0, 0)),
        ),
        compiler_params=pltpu.CompilerParams(
            dimension_semantics=("parallel",),
            vmem_limit_bytes=vmem_limit,
        ),
    )(*args)

    if Lqp != Lq:
        out = out[:, :Lq, :]
    if transpose_output:
        # (B, Lq, E) -> (Lq, B, E) to match the PyTorch module's output layout.
        # AttentionalDecoder immediately transposes back, so fused callers can
        # pass transpose_output=False and skip both transposes.
        return jnp.transpose(out, (1, 0, 2))
    return out


# ------------------------ pure-JAX reference (f32) ------------------------

def _reference_forward(x, params, *, num_heads, query_len):
    B, E, H, W = x.shape
    Lk, Lq, d = H * W, query_len, E // num_heads
    key = jnp.transpose(x.reshape(B, E, Lk), (0, 2, 1))           # (B, Lk, E)
    pe_q, pe_k = _sinusoidal_pe(Lq, E), _sinusoidal_pe(Lk, E)
    q_res = pe_q @ params["w_qproj"].T + params["b_qproj"]
    v_in = pe_k @ params["w_vproj"].T + params["b_vproj"]
    q = q_res @ params["w_q"].T + params["b_q"]
    v = v_in @ params["w_v"].T + params["b_v"]
    outs = []
    for b in range(B):
        k = key[b] @ params["w_k"].T + params["b_k"]
        heads = []
        for h in range(num_heads):
            qs = q[:, h * d:(h + 1) * d] / math.sqrt(d)
            s = qs @ k[:, h * d:(h + 1) * d].T
            p = jax.nn.softmax(s, axis=-1)
            heads.append(p @ v[:, h * d:(h + 1) * d])
        ctx = jnp.concatenate(heads, axis=-1)
        attn = ctx @ params["w_o"].T + params["b_o"]
        out1 = _layernorm(attn + q_res, params["ln1_g"], params["ln1_b"])
        h1 = jnp.maximum(out1 @ params["w_ffn1"].T + params["b_ffn1"], 0.0)
        ffn = h1 @ params["w_ffn2"].T + params["b_ffn2"]
        outs.append(_layernorm(out1 + ffn, params["ln2_g"], params["ln2_b"]))
    return jnp.stack(outs, axis=1)    # (Lq, B, E)


def init_params(key, E, F):
    ks = jax.random.split(key, 12)

    def w(k, shape):
        return 0.05 * jax.random.normal(k, shape, jnp.float32)

    return dict(
        # query_project / value_project (nn.Linear(E, E))
        w_qproj=w(ks[0], (E, E)), b_qproj=w(ks[1], (E,)),
        w_vproj=w(ks[2], (E, E)), b_vproj=w(ks[3], (E,)),
        # nn.MultiheadAttention in_proj (split into q/k/v) + out_proj
        w_q=w(ks[4], (E, E)), b_q=jnp.zeros((E,), jnp.float32),
        w_k=w(ks[5], (E, E)), b_k=jnp.zeros((E,), jnp.float32),
        w_v=w(ks[6], (E, E)), b_v=jnp.zeros((E,), jnp.float32),
        w_o=w(ks[7], (E, E)), b_o=jnp.zeros((E,), jnp.float32),
        # LayerNorms (default init)
        ln1_g=jnp.ones((E,), jnp.float32), ln1_b=jnp.zeros((E,), jnp.float32),
        ln2_g=jnp.ones((E,), jnp.float32), ln2_b=jnp.zeros((E,), jnp.float32),
        # FFN Conv1d(E->F,1) and Conv1d(F->E,1) as linear weights
        w_ffn1=w(ks[8], (F, E)), b_ffn1=w(ks[9], (F,)),
        w_ffn2=w(ks[10], (E, F)), b_ffn2=w(ks[11], (E,)),
    )


if __name__ == "__main__":
    # small shapes consistent with the module:
    #   query_dim = key_dim = value_dim = E,  key_len = value_len = H*W,
    #   query_len = max_seq_length, feedforward_dim = FFN hidden
    B, E, H, W = 2, 32, 4, 4
    num_heads = 4          # head_dim = 8 (512/8 = 64 in the real model)
    query_len = 8
    feedforward_dim = 64

    root = jax.random.PRNGKey(0)
    kx, kp = jax.random.split(root)
    x = jax.random.normal(kx, (B, E, H, W), jnp.float32)
    params = init_params(kp, E, feedforward_dim)

    out = object_query_attention_forward(
        x, params, num_heads=num_heads, query_len=query_len)
    out = jax.block_until_ready(out)

    assert out.shape == (query_len, B, E), out.shape
    assert bool(jnp.all(jnp.isfinite(out)))

    # compare against a pure-JAX f32 reference (bf16 MXU + approx reciprocal tolerance)
    ref = _reference_forward(x, params, num_heads=num_heads, query_len=query_len)
    max_err = float(jnp.max(jnp.abs(out - ref)))
    assert max_err < 5e-2, f"max abs error vs reference: {max_err}"

    print("KERNEL_OK")
</pallas_src>

<mosaic_0001>
module attributes {stable_mosaic.version = 11 : i64} {
  func.func @kernel(%arg0: i32, %arg1: memref<1x32x16xbf16, #tpu.memory_space<vmem>>, %arg2: memref<32x32xbf16, #tpu.memory_space<vmem>>, %arg3: memref<8x32xf32, #tpu.memory_space<vmem>>, %arg4: memref<4x16x8xbf16, #tpu.memory_space<vmem>>, %arg5: memref<4x8x32xbf16, #tpu.memory_space<vmem>>, %arg6: memref<1x32xf32, #tpu.memory_space<vmem>>, %arg7: memref<1x32xf32, #tpu.memory_space<vmem>>, %arg8: memref<1x32xf32, #tpu.memory_space<vmem>>, %arg9: memref<32x64xbf16, #tpu.memory_space<vmem>>, %arg10: memref<1x64xf32, #tpu.memory_space<vmem>>, %arg11: memref<64x32xbf16, #tpu.memory_space<vmem>>, %arg12: memref<1x32xf32, #tpu.memory_space<vmem>>, %arg13: memref<1x32xf32, #tpu.memory_space<vmem>>, %arg14: memref<1x32xf32, #tpu.memory_space<vmem>>, %arg15: memref<1x8x32xf32, #tpu.memory_space<vmem>>) attributes {dimension_semantics = [#tpu.dimension_semantics<parallel>], iteration_bounds = array<i64: 2>, scalar_prefetch = 0 : i64, scratch_operands = 0 : i64, tpu.core_type = #tpu.core_type<tc>, window_params = [{transform_indices = @transform_0, window_bounds = array<i64: 1, 32, 16>}, {pipeline_mode = #tpu.pipeline_mode<synchronous>, transform_indices = @transform_1, window_bounds = array<i64: 32, 32>}, {pipeline_mode = #tpu.pipeline_mode<synchronous>, transform_indices = @transform_2, window_bounds = array<i64: 8, 32>}, {pipeline_mode = #tpu.pipeline_mode<synchronous>, transform_indices = @transform_3, window_bounds = array<i64: 4, 16, 8>}, {pipeline_mode = #tpu.pipeline_mode<synchronous>, transform_indices = @transform_4, window_bounds = array<i64: 4, 8, 32>}, {pipeline_mode = #tpu.pipeline_mode<synchronous>, transform_indices = @transform_5, window_bounds = array<i64: 1, 32>}, {pipeline_mode = #tpu.pipeline_mode<synchronous>, transform_indices = @transform_6, window_bounds = array<i64: 1, 32>}, {pipeline_mode = #tpu.pipeline_mode<synchronous>, transform_indices = @transform_7, window_bounds = array<i64: 1, 32>}, {pipeline_mode = #tpu.pipeline_mode<synchronous>, transform_indices = @transform_8, window_bounds = array<i64: 32, 64>}, {pipeline_mode = #tpu.pipeline_mode<synchronous>, transform_indices = @transform_9, window_bounds = array<i64: 1, 64>}, {pipeline_mode = #tpu.pipeline_mode<synchronous>, transform_indices = @transform_10, window_bounds = array<i64: 64, 32>}, {pipeline_mode = #tpu.pipeline_mode<synchronous>, transform_indices = @transform_11, window_bounds = array<i64: 1, 32>}, {pipeline_mode = #tpu.pipeline_mode<synchronous>, transform_indices = @transform_12, window_bounds = array<i64: 1, 32>}, {pipeline_mode = #tpu.pipeline_mode<synchronous>, transform_indices = @transform_13, window_bounds = array<i64: 1, 32>}, {transform_indices = @transform_14, window_bounds = array<i64: 1, 8, 32>}]} {
    %c0 = arith.constant 0 : index
    %c0_0 = arith.constant 0 : index
    %0 = vector.load %arg2[%c0, %c0_0] : memref<32x32xbf16, #tpu.memory_space<vmem>>, vector<32x32xbf16>
    %c0_1 = arith.constant 0 : index
    %c0_2 = arith.constant 0 : index
    %1 = vector.load %arg3[%c0_1, %c0_2] : memref<8x32xf32, #tpu.memory_space<vmem>>, vector<8x32xf32>
    %c0_3 = arith.constant 0 : index
    %c0_4 = arith.constant 0 : index
    %c0_5 = arith.constant 0 : index
    %2 = vector.load %arg4[%c0_3, %c0_4, %c0_5] : memref<4x16x8xbf16, #tpu.memory_space<vmem>>, vector<4x16x8xbf16>
    %c0_6 = arith.constant 0 : index
    %c0_7 = arith.constant 0 : index
    %c0_8 = arith.constant 0 : index
    %3 = vector.load %arg5[%c0_6, %c0_7, %c0_8] : memref<4x8x32xbf16, #tpu.memory_space<vmem>>, vector<4x8x32xbf16>
    %c0_9 = arith.constant 0 : index
    %c0_10 = arith.constant 0 : index
    %4 = vector.load %arg6[%c0_9, %c0_10] : memref<1x32xf32, #tpu.memory_space<vmem>>, vector<1x32xf32>
    %c0_11 = arith.constant 0 : index
    %c0_12 = arith.constant 0 : index
    %5 = vector.load %arg7[%c0_11, %c0_12] : memref<1x32xf32, #tpu.memory_space<vmem>>, vector<1x32xf32>
    %c0_13 = arith.constant 0 : index
    %c0_14 = arith.constant 0 : index
    %6 = vector.load %arg8[%c0_13, %c0_14] : memref<1x32xf32, #tpu.memory_space<vmem>>, vector<1x32xf32>
    %c0_15 = arith.constant 0 : index
    %c0_16 = arith.constant 0 : index
    %7 = vector.load %arg9[%c0_15, %c0_16] : memref<32x64xbf16, #tpu.memory_space<vmem>>, vector<32x64xbf16>
    %c0_17 = arith.constant 0 : index
    %c0_18 = arith.constant 0 : index
    %8 = vector.load %arg10[%c0_17, %c0_18] : memref<1x64xf32, #tpu.memory_space<vmem>>, vector<1x64xf32>
    %c0_19 = arith.constant 0 : index
    %c0_20 = arith.constant 0 : index
    %9 = vector.load %arg11[%c0_19, %c0_20] : memref<64x32xbf16, #tpu.memory_space<vmem>>, vector<64x32xbf16>
    %c0_21 = arith.constant 0 : index
    %c0_22 = arith.constant 0 : index
    %10 = vector.load %arg12[%c0_21, %c0_22] : memref<1x32xf32, #tpu.memory_space<vmem>>, vector<1x32xf32>
    %c0_23 = arith.constant 0 : index
    %c0_24 = arith.constant 0 : index
    %11 = vector.load %arg13[%c0_23, %c0_24] : memref<1x32xf32, #tpu.memory_space<vmem>>, vector<1x32xf32>
    %c0_25 = arith.constant 0 : index
    %c0_26 = arith.constant 0 : index
    %12 = vector.load %arg14[%c0_25, %c0_26] : memref<1x32xf32, #tpu.memory_space<vmem>>, vector<1x32xf32>
    %c0_27 = arith.constant 0 : index
    %c0_28 = arith.constant 0 : index
    %c0_29 = arith.constant 0 : index
    %13 = vector.load %arg1[%c0_27, %c0_28, %c0_29] : memref<1x32x16xbf16, #tpu.memory_space<vmem>>, vector<1x32x16xbf16>
    %14 = vector.shape_cast %13 : vector<1x32x16xbf16> to vector<32x16xbf16>
    %cst = arith.constant dense<0.000000e+00> : vector<32x16xf32>
    %15 = tpu.matmul %0, %14, %cst {dimension_numbers = #tpu.dot_dimension_numbers<[1], [0], [0], [1], [0, 0, 1, 1], [], []>} : vector<32x32xbf16>, vector<32x16xbf16>, vector<32x16xf32> -> vector<32x16xf32>
    %cst_30 = arith.constant dense<0xFF800000> : vector<32xf32>
    %16 = vector.multi_reduction <maximumf>, %15, %cst_30 [1] : vector<32x16xf32> to vector<32xf32>
    %17 = vector.shape_cast %16 : vector<32xf32> to vector<32x1xf32>
    %18 = vector.broadcast %17 : vector<32x1xf32> to vector<32x16xf32>
    %19 = arith.subf %15, %18 : vector<32x16xf32>
    %20 = math.exp %19 : vector<32x16xf32>
    %cst_31 = arith.constant dense<0.000000e+00> : vector<32xf32>
    %21 = vector.multi_reduction <add>, %20, %cst_31 [1] : vector<32x16xf32> to vector<32xf32>
    %22 = vector.shape_cast %21 : vector<32xf32> to vector<32x1xf32>
    %23 = tpu.reciprocal %22 {approx = true} : vector<32x1xf32> -> vector<32x1xf32>
    %24 = vector.broadcast %23 : vector<32x1xf32> to vector<32x16xf32>
    %25 = arith.mulf %20, %24 : vector<32x16xf32>
    %26 = arith.truncf %25 : vector<32x16xf32> to vector<32x16xbf16>
    %27 = vector.extract_strided_slice %26 {offsets = [0, 0], sizes = [8, 16], strides = [1, 1]} : vector<32x16xbf16> to vector<8x16xbf16>
    %28 = vector.extract_strided_slice %2 {offsets = [0, 0, 0], sizes = [1, 16, 8], strides = [1, 1, 1]} : vector<4x16x8xbf16> to vector<1x16x8xbf16>
    %29 = vector.shape_cast %28 : vector<1x16x8xbf16> to vector<16x8xbf16>
    %cst_32 = arith.constant dense<0.000000e+00> : vector<8x8xf32>
    %30 = tpu.matmul %27, %29, %cst_32 {dimension_numbers = #tpu.dot_dimension_numbers<[1], [0], [0], [1], [0, 0, 1, 1], [], []>} : vector<8x16xbf16>, vector<16x8xbf16>, vector<8x8xf32> -> vector<8x8xf32>
    %31 = arith.truncf %30 : vector<8x8xf32> to vector<8x8xbf16>
    %32 = vector.extract_strided_slice %3 {offsets = [0, 0, 0], sizes = [1, 8, 32], strides = [1, 1, 1]} : vector<4x8x32xbf16> to vector<1x8x32xbf16>
    %33 = vector.shape_cast %32 : vector<1x8x32xbf16> to vector<8x32xbf16>
    %cst_33 = arith.constant dense<0.000000e+00> : vector<8x32xf32>
    %34 = tpu.matmul %31, %33, %cst_33 {dimension_numbers = #tpu.dot_dimension_numbers<[1], [0], [0], [1], [0, 0, 1, 1], [], []>} : vector<8x8xbf16>, vector<8x32xbf16>, vector<8x32xf32> -> vector<8x32xf32>
    %35 = vector.extract_strided_slice %26 {offsets = [8, 0], sizes = [8, 16], strides = [1, 1]} : vector<32x16xbf16> to vector<8x16xbf16>
    %36 = vector.extract_strided_slice %2 {offsets = [1, 0, 0], sizes = [1, 16, 8], strides = [1, 1, 1]} : vector<4x16x8xbf16> to vector<1x16x8xbf16>
    %37 = vector.shape_cast %36 : vector<1x16x8xbf16> to vector<16x8xbf16>
    %cst_34 = arith.constant dense<0.000000e+00> : vector<8x8xf32>
    %38 = tpu.matmul %35, %37, %cst_34 {dimension_numbers = #tpu.dot_dimension_numbers<[1], [0], [0], [1], [0, 0, 1, 1], [], []>} : vector<8x16xbf16>, vector<16x8xbf16>, vector<8x8xf32> -> vector<8x8xf32>
    %39 = arith.truncf %38 : vector<8x8xf32> to vector<8x8xbf16>
    %40 = vector.extract_strided_slice %3 {offsets = [1, 0, 0], sizes = [1, 8, 32], strides = [1, 1, 1]} : vector<4x8x32xbf16> to vector<1x8x32xbf16>
    %41 = vector.shape_cast %40 : vector<1x8x32xbf16> to vector<8x32xbf16>
    %cst_35 = arith.constant dense<0.000000e+00> : vector<8x32xf32>
    %42 = tpu.matmul %39, %41, %cst_35 {dimension_numbers = #tpu.dot_dimension_numbers<[1], [0], [0], [1], [0, 0, 1, 1], [], []>} : vector<8x8xbf16>, vector<8x32xbf16>, vector<8x32xf32> -> vector<8x32xf32>
    %43 = arith.addf %34, %42 : vector<8x32xf32>
    %44 = vector.extract_strided_slice %26 {offsets = [16, 0], sizes = [8, 16], strides = [1, 1]} : vector<32x16xbf16> to vector<8x16xbf16>
    %45 = vector.extract_strided_slice %2 {offsets = [2, 0, 0], sizes = [1, 16, 8], strides = [1, 1, 1]} : vector<4x16x8xbf16> to vector<1x16x8xbf16>
    %46 = vector.shape_cast %45 : vector<1x16x8xbf16> to vector<16x8xbf16>
    %cst_36 = arith.constant dense<0.000000e+00> : vector<8x8xf32>
    %47 = tpu.matmul %44, %46, %cst_36 {dimension_numbers = #tpu.dot_dimension_numbers<[1], [0], [0], [1], [0, 0, 1, 1], [], []>} : vector<8x16xbf16>, vector<16x8xbf16>, vector<8x8xf32> -> vector<8x8xf32>
    %48 = arith.truncf %47 : vector<8x8xf32> to vector<8x8xbf16>
    %49 = vector.extract_strided_slice %3 {offsets = [2, 0, 0], sizes = [1, 8, 32], strides = [1, 1, 1]} : vector<4x8x32xbf16> to vector<1x8x32xbf16>
    %50 = vector.shape_cast %49 : vector<1x8x32xbf16> to vector<8x32xbf16>
    %cst_37 = arith.constant dense<0.000000e+00> : vector<8x32xf32>
    %51 = tpu.matmul %48, %50, %cst_37 {dimension_numbers = #tpu.dot_dimension_numbers<[1], [0], [0], [1], [0, 0, 1, 1], [], []>} : vector<8x8xbf16>, vector<8x32xbf16>, vector<8x32xf32> -> vector<8x32xf32>
    %52 = arith.addf %43, %51 : vector<8x32xf32>
    %53 = vector.extract_strided_slice %26 {offsets = [24, 0], sizes = [8, 16], strides = [1, 1]} : vector<32x16xbf16> to vector<8x16xbf16>
    %54 = vector.extract_strided_slice %2 {offsets = [3, 0, 0], sizes = [1, 16, 8], strides = [1, 1, 1]} : vector<4x16x8xbf16> to vector<1x16x8xbf16>
    %55 = vector.shape_cast %54 : vector<1x16x8xbf16> to vector<16x8xbf16>
    %cst_38 = arith.constant dense<0.000000e+00> : vector<8x8xf32>
    %56 = tpu.matmul %53, %55, %cst_38 {dimension_numbers = #tpu.dot_dimension_numbers<[1], [0], [0], [1], [0, 0, 1, 1], [], []>} : vector<8x16xbf16>, vector<16x8xbf16>, vector<8x8xf32> -> vector<8x8xf32>
    %57 = arith.truncf %56 : vector<8x8xf32> to vector<8x8xbf16>
    %58 = vector.extract_strided_slice %3 {offsets = [3, 0, 0], sizes = [1, 8, 32], strides = [1, 1, 1]} : vector<4x8x32xbf16> to vector<1x8x32xbf16>
    %59 = vector.shape_cast %58 : vector<1x8x32xbf16> to vector<8x32xbf16>
    %cst_39 = arith.constant dense<0.000000e+00> : vector<8x32xf32>
    %60 = tpu.matmul %57, %59, %cst_39 {dimension_numbers = #tpu.dot_dimension_numbers<[1], [0], [0], [1], [0, 0, 1, 1], [], []>} : vector<8x8xbf16>, vector<8x32xbf16>, vector<8x32xf32> -> vector<8x32xf32>
    %61 = arith.addf %52, %60 : vector<8x32xf32>
    %62 = vector.broadcast %4 : vector<1x32xf32> to vector<8x32xf32>
    %63 = arith.addf %61, %62 : vector<8x32xf32>
    %64 = arith.addf %63, %1 : vector<8x32xf32>
    %cst_40 = arith.constant dense<0.000000e+00> : vector<8xf32>
    %65 = vector.multi_reduction <add>, %64, %cst_40 [1] : vector<8x32xf32> to vector<8xf32>
    %66 = vector.shape_cast %65 : vector<8xf32> to vector<8x1xf32>
    %cst_41 = arith.constant 3.200000e+01 : f32
    %67 = vector.broadcast %cst_41 : f32 to vector<8x1xf32>
    %68 = arith.divf %66, %67 : vector<8x1xf32>
    %69 = vector.broadcast %68 : vector<8x1xf32> to vector<8x32xf32>
    %70 = arith.subf %64, %69 : vector<8x32xf32>
    %71 = arith.mulf %70, %70 : vector<8x32xf32>
    %cst_42 = arith.constant dense<0.000000e+00> : vector<8xf32>
    %72 = vector.multi_reduction <add>, %71, %cst_42 [1] : vector<8x32xf32> to vector<8xf32>
    %73 = vector.shape_cast %72 : vector<8xf32> to vector<8x1xf32>
    %cst_43 = arith.constant 3.200000e+01 : f32
    %74 = vector.broadcast %cst_43 : f32 to vector<8x1xf32>
    %75 = arith.divf %73, %74 : vector<8x1xf32>
    %76 = vector.broadcast %68 : vector<8x1xf32> to vector<8x32xf32>
    %77 = arith.subf %64, %76 : vector<8x32xf32>
    %cst_44 = arith.constant 9.99999974E-6 : f32
    %78 = vector.broadcast %cst_44 : f32 to vector<8x1xf32>
    %79 = arith.addf %75, %78 : vector<8x1xf32>
    %80 = math.rsqrt %79 : vector<8x1xf32>
    %81 = vector.broadcast %80 : vector<8x1xf32> to vector<8x32xf32>
    %82 = arith.mulf %77, %81 : vector<8x32xf32>
    %83 = vector.broadcast %5 : vector<1x32xf32> to vector<8x32xf32>
    %84 = arith.mulf %82, %83 : vector<8x32xf32>
    %85 = vector.broadcast %6 : vector<1x32xf32> to vector<8x32xf32>
    %86 = arith.addf %84, %85 : vector<8x32xf32>
    %87 = arith.truncf %86 : vector<8x32xf32> to vector<8x32xbf16>
    %cst_45 = arith.constant dense<0.000000e+00> : vector<8x64xf32>
    %88 = tpu.matmul %87, %7, %cst_45 {dimension_numbers = #tpu.dot_dimension_numbers<[1], [0], [0], [1], [0, 0, 1, 1], [], []>} : vector<8x32xbf16>, vector<32x64xbf16>, vector<8x64xf32> -> vector<8x64xf32>
    %89 = vector.broadcast %8 : vector<1x64xf32> to vector<8x64xf32>
    %90 = arith.addf %88, %89 : vector<8x64xf32>
    %cst_46 = arith.constant 0.000000e+00 : f32
    %91 = vector.broadcast %cst_46 : f32 to vector<8x64xf32>
    %92 = arith.maximumf %90, %91 : vector<8x64xf32>
    %93 = arith.truncf %92 : vector<8x64xf32> to vector<8x64xbf16>
    %cst_47 = arith.constant dense<0.000000e+00> : vector<8x32xf32>
    %94 = tpu.matmul %93, %9, %cst_47 {dimension_numbers = #tpu.dot_dimension_numbers<[1], [0], [0], [1], [0, 0, 1, 1], [], []>} : vector<8x64xbf16>, vector<64x32xbf16>, vector<8x32xf32> -> vector<8x32xf32>
    %95 = vector.broadcast %10 : vector<1x32xf32> to vector<8x32xf32>
    %96 = arith.addf %94, %95 : vector<8x32xf32>
    %97 = arith.addf %86, %96 : vector<8x32xf32>
    %cst_48 = arith.constant dense<0.000000e+00> : vector<8xf32>
    %98 = vector.multi_reduction <add>, %97, %cst_48 [1] : vector<8x32xf32> to vector<8xf32>
    %99 = vector.shape_cast %98 : vector<8xf32> to vector<8x1xf32>
    %cst_49 = arith.constant 3.200000e+01 : f32
    %100 = vector.broadcast %cst_49 : f32 to vector<8x1xf32>
    %101 = arith.divf %99, %100 : vector<8x1xf32>
    %102 = vector.broadcast %101 : vector<8x1xf32> to vector<8x32xf32>
    %103 = arith.subf %97, %102 : vector<8x32xf32>
    %104 = arith.mulf %103, %103 : vector<8x32xf32>
    %cst_50 = arith.constant dense<0.000000e+00> : vector<8xf32>
    %105 = vector.multi_reduction <add>, %104, %cst_50 [1] : vector<8x32xf32> to vector<8xf32>
    %106 = vector.shape_cast %105 : vector<8xf32> to vector<8x1xf32>
    %cst_51 = arith.constant 3.200000e+01 : f32
    %107 = vector.broadcast %cst_51 : f32 to vector<8x1xf32>
    %108 = arith.divf %106, %107 : vector<8x1xf32>
    %109 = vector.broadcast %101 : vector<8x1xf32> to vector<8x32xf32>
    %110 = arith.subf %97, %109 : vector<8x32xf32>
    %cst_52 = arith.constant 9.99999974E-6 : f32
    %111 = vector.broadcast %cst_52 : f32 to vector<8x1xf32>
    %112 = arith.addf %108, %111 : vector<8x1xf32>
    %113 = math.rsqrt %112 : vector<8x1xf32>
    %114 = vector.broadcast %113 : vector<8x1xf32> to vector<8x32xf32>
    %115 = arith.mulf %110, %114 : vector<8x32xf32>
    %116 = vector.broadcast %11 : vector<1x32xf32> to vector<8x32xf32>
    %117 = arith.mulf %115, %116 : vector<8x32xf32>
    %118 = vector.broadcast %12 : vector<1x32xf32> to vector<8x32xf32>
    %119 = arith.addf %117, %118 : vector<8x32xf32>
    %c0_53 = arith.constant 0 : index
    %c0_54 = arith.constant 0 : index
    %c0_55 = arith.constant 0 : index
    %120 = vector.load %arg15[%c0_53, %c0_54, %c0_55] : memref<1x8x32xf32, #tpu.memory_space<vmem>>, vector<1x8x32xf32>
    %121 = vector.shape_cast %120 : vector<1x8x32xf32> to vector<8x32xf32>
    %122 = vector.shape_cast %119 : vector<8x32xf32> to vector<1x8x32xf32>
    tpu.vector_store %arg15[%c0_53, %c0_54, %c0_55], %122 {strides = array<i32>} : memref<1x8x32xf32, #tpu.memory_space<vmem>>, vector<1x8x32xf32>,
    return
  }
  func.func @transform_0(%arg0: i32) -> (i32, i32, i32) {
    %c0_i32 = arith.constant 0 : i32
    %c0_i32_0 = arith.constant 0 : i32
    %c0_i32_1 = arith.constant 0 : i32
    return %arg0, %c0_i32, %c0_i32_0 : i32, i32, i32
  }
  func.func @transform_1(%arg0: i32) -> (i32, i32) {
    %c0_i32 = arith.constant 0 : i32
    %c0_i32_0 = arith.constant 0 : i32
    %c0_i32_1 = arith.constant 0 : i32
    return %c0_i32, %c0_i32_0 : i32, i32
  }
  func.func @transform_2(%arg0: i32) -> (i32, i32) {
    %c0_i32 = arith.constant 0 : i32
    %c0_i32_0 = arith.constant 0 : i32
    %c0_i32_1 = arith.constant 0 : i32
    return %c0_i32, %c0_i32_0 : i32, i32
  }
  func.func @transform_3(%arg0: i32) -> (i32, i32, i32) {
    %c0_i32 = arith.constant 0 : i32
    %c0_i32_0 = arith.constant 0 : i32
    %c0_i32_1 = arith.constant 0 : i32
    %c0_i32_2 = arith.constant 0 : i32
    return %c0_i32, %c0_i32_0, %c0_i32_1 : i32, i32, i32
  }
  func.func @transform_4(%arg0: i32) -> (i32, i32, i32) {
    %c0_i32 = arith.constant 0 : i32
    %c0_i32_0 = arith.constant 0 : i32
    %c0_i32_1 = arith.constant 0 : i32
    %c0_i32_2 = arith.constant 0 : i32
    return %c0_i32, %c0_i32_0, %c0_i32_1 : i32, i32, i32
  }
  func.func @transform_5(%arg0: i32) -> (i32, i32) {
    %c0_i32 = arith.constant 0 : i32
    %c0_i32_0 = arith.constant 0 : i32
    %c0_i32_1 = arith.constant 0 : i32
    return %c0_i32, %c0_i32_0 : i32, i32
  }
  func.func @transform_6(%arg0: i32) -> (i32, i32) {
    %c0_i32 = arith.constant 0 : i32
    %c0_i32_0 = arith.constant 0 : i32
    %c0_i32_1 = arith.constant 0 : i32
    return %c0_i32, %c0_i32_0 : i32, i32
  }
  func.func @transform_7(%arg0: i32) -> (i32, i32) {
    %c0_i32 = arith.constant 0 : i32
    %c0_i32_0 = arith.constant 0 : i32
    %c0_i32_1 = arith.constant 0 : i32
    return %c0_i32, %c0_i32_0 : i32, i32
  }
  func.func @transform_8(%arg0: i32) -> (i32, i32) {
    %c0_i32 = arith.constant 0 : i32
    %c0_i32_0 = arith.constant 0 : i32
    %c0_i32_1 = arith.constant 0 : i32
    return %c0_i32, %c0_i32_0 : i32, i32
  }
  func.func @transform_9(%arg0: i32) -> (i32, i32) {
    %c0_i32 = arith.constant 0 : i32
    %c0_i32_0 = arith.constant 0 : i32
    %c0_i32_1 = arith.constant 0 : i32
    return %c0_i32, %c0_i32_0 : i32, i32
  }
  func.func @transform_10(%arg0: i32) -> (i32, i32) {
    %c0_i32 = arith.constant 0 : i32
    %c0_i32_0 = arith.constant 0 : i32
    %c0_i32_1 = arith.constant 0 : i32
    return %c0_i32, %c0_i32_0 : i32, i32
  }
  func.func @transform_11(%arg0: i32) -> (i32, i32) {
    %c0_i32 = arith.constant 0 : i32
    %c0_i32_0 = arith.constant 0 : i32
    %c0_i32_1 = arith.constant 0 : i32
    return %c0_i32, %c0_i32_0 : i32, i32
  }
  func.func @transform_12(%arg0: i32) -> (i32, i32) {
    %c0_i32 = arith.constant 0 : i32
    %c0_i32_0 = arith.constant 0 : i32
    %c0_i32_1 = arith.constant 0 : i32
    return %c0_i32, %c0_i32_0 : i32, i32
  }
  func.func @transform_13(%arg0: i32) -> (i32, i32) {
    %c0_i32 = arith.constant 0 : i32
    %c0_i32_0 = arith.constant 0 : i32
    %c0_i32_1 = arith.constant 0 : i32
    return %c0_i32, %c0_i32_0 : i32, i32
  }
  func.func @transform_14(%arg0: i32) -> (i32, i32, i32) {
    %c0_i32 = arith.constant 0 : i32
    %c0_i32_0 = arith.constant 0 : i32
    %c0_i32_1 = arith.constant 0 : i32
    return %arg0, %c0_i32, %c0_i32_0 : i32, i32, i32
  }
}

</mosaic_0001>

<bundles_post_ra>
// kernel: tpu_custom_call.1
= control target key start
LH: loop header
LB: loop body
LE: loop exit
PB: predicated region body
PF: predicated region fallthrough
CT: control target
= control target key end

     0   :  { %s1904_s0 = inlined_call_operand.vmem [shape: bf16[2,32,16], index: 0, kind: input, shape index: {}]   ;;  %s1905_s1 = inlined_call_operand.vmem [shape: bf16[32,32], index: 1, kind: input, shape index: {}]   ;;  %s1906_s2 = inlined_call_operand.vmem [shape: f32[8,32], index: 2, kind: input, shape index: {}]   ;;  %s1907_s3 = inlined_call_operand.vmem [shape: bf16[4,16,8], index: 3, kind: input, shape index: {}]   ;;  %s1908_s4 = inlined_call_operand.vmem [shape: bf16[4,8,32], index: 4, kind: input, shape index: {}]   ;;  %s1909_s5 = inlined_call_operand.vmem [shape: f32[1,32], index: 5, kind: input, shape index: {}]   ;;  %s1910_s6 = inlined_call_operand.vmem [shape: f32[1,32], index: 6, kind: input, shape index: {}]   ;;  %s1911_s7 = inlined_call_operand.vmem [shape: f32[1,32], index: 7, kind: input, shape index: {}]   ;;  %s1912_s8 = inlined_call_operand.vmem [shape: bf16[32,64], index: 8, kind: input, shape index: {}]   ;;  %s1913_s9 = inlined_call_operand.vmem [shape: f32[1,64], index: 9, kind: input, shape index: {}]   ;;  %s1914_s10 = inlined_call_operand.vmem [shape: bf16[64,32], index: 10, kind: input, shape index: {}]   ;;  %s1915_s11 = inlined_call_operand.vmem [shape: f32[1,32], index: 11, kind: input, shape index: {}]   ;;  %s1916_s12 = inlined_call_operand.vmem [shape: f32[1,32], index: 12, kind: input, shape index: {}]   ;;  %s1917_s13 = inlined_call_operand.vmem [shape: f32[1,32], index: 13, kind: input, shape index: {}]   ;;  %s1918_s14 = inlined_call_operand.hbm [shape: f32[2,8,32], index: 14, kind: output, shape index: {}]  }
   0x1   :  { %1920 = sst [smem:[#allocation7_spill]] %s1904_s0 }
   0x2   :  { %1921 = sst [smem:[#allocation8_spill]] %s1905_s1 }
   0x3   :  { %1922 = sst [smem:[#allocation9_spill]] %s1906_s2 }
   0x4   :  { %19 = vsyncpa [#allocation3], 0 }
   0x5   :  { %21 = vsyncpa [#allocation3 + $0x1], 0  ;;  %s1666_s29 = smov 0   ;;  %s1668_s30 = smov 0  }
   0x6   :  { %s1670_s15 = smov 0   ;;  %s1672_s16 = smov 0  }
   0x7 LB: > { %1923 = sst [smem:[#allocation5_spill]] %s1582_s15  ;;  %s1687_s17 = sadd.s32 4294967295, %s1586_s16   ;;  %s1586_s16 = sphi %s1672_s16, %s1934_s16   ;;  %s1582_s15 = sphi %s1670_s15, %s1931_s15   ;;  %s1578_s30 = sphi %s1668_s30, %s1933_s30   ;;  %s1574_s29 = sphi %s1666_s29, %s1932_s29  }
   0x8   : > { %s1300_s18 = sadd.s32 4294967294, %s1586_s16   ;;  %s1691_s19 = sadd.s32 1, %s1586_s16  }
   0x9   : > { %s333_s20 = sadd.s32 1, %s1582_s15  ;;  %s330_s21 = ssub.s32 %s1586_s16, %s1691_s19 }
   0xa   : > { %p343_p0 = scmp.ne.s32.totalorder %s1582_s15, %s1578_s30  ;;  %p331_p1 = scmp.eq.s32.totalorder %s330_s21, 0 }
   0xb   : > { %p344_p2 = scmp.eq.s32.totalorder %s1687_s17, 1  ;;  %p349_p3 = scmp.ne.s32.totalorder %s1578_s30, %s1574_s29 }
   0xc   : > { %p350_p4 = scmp.eq.s32.totalorder %s1300_s18, 1  ;;  %p1303_p7 = scmp.ge.s32.totalorder %s1586_s16, 1 }
   0xd   : > { %s1702_s22 = scalar_select %p331_p1, %s1582_s15, %s333_s20  }
   0xe   : > { %p1704_p5 = por %p344_p2, %p343_p0  ;;  %p1708_p6 = por %p350_p4, %p349_p3 }
   0xf   : > { %1924 = sst [smem:[#allocation6_spill]] %s1702_s22  ;;  %p415_p8 = scmp.lt.s32.totalorder %s1586_s16, 3 }
  0x11   : > { %p416_p9 = pnand %p1303_p7, %p415_p8 }
  0x12   : > { %p461_p10 = scmp.lt.s32.totalorder (!%p416_p9), %s1687_s17, 1  ;;  %s1927_s1 = sld [smem:[#allocation8_spill]] (!%p416_p9)  ;;  %vm529_vm0 = vcmask (!%p416_p9), 261120   ;;  %vm585_vm1 = vcmask (!%p416_p9), 130048   ;;  %v1494_v27 = vld [vmem:[%s1907_s3] sm:$0xff] (!%p416_p9)   ;;  %v1588_v28 = vmov (!%p416_p9), 0.0  }
  0x13   : > { %419 = sbr.rel (%p416_p9) target bundleno = 2312 (0x908), region = 76  ;;  %s1928_s0 = sld [smem:[#allocation7_spill]] (!%p416_p9)  ;;  %1387 = vmatprep.subr.bf16.mxu1 (!%p416_p9), %v1588_v28  ;;  %v1495_v29 = vld [vmem:[%s1907_s3 + $0x8] sm:$0xff] (!%p416_p9)   ;;  %vm1589_vm2 = vmmov (!%p416_p9), 0   ;;  %v481_v43 = vld [vmem:[%s1908_s4 + $0x4] sm:$0xf] (!%p416_p9) }
  0x14   : > { %1388 = vmatpush3.bf16.msra.mxu1 (!%p416_p9), %v1495_v29  ;;  %1389 = vmatprep.mubr.msk.bf16.mxu1 (!%p416_p9), %vm1589_vm2, %v1588_v28  ;;  %vm738_vm3 = vcmask (!%p416_p9), 1043456   ;;  %v480_v45 = vld [vmem:[%s1908_s4] sm:$0xf] (!%p416_p9)  ;;  %vm734_vm4 = vcmask (!%p416_p9), 64512   ;;  %v1496_v54 = vld [vmem:[%s1907_s3 + $0x10] sm:$0xff] (!%p416_p9)   ;;  %s1929_s2 = sld [smem:[#allocation9_spill]] (!%p416_p9) }
  0x15   : > { %1399 = vmatprep.subr.bf16.mxu1 (!%p416_p9), %v1588_v28  ;;  %v740_v44 = vsel (!%p416_p9), %vm738_vm3, %v481_v43, 0  ;;  %v786_v46 = vsel (!%p416_p9), %vm738_vm3, %v480_v45, 0  ;;  %vm1154_vm5 = vcmask (!%p416_p9), 523264   ;;  %s1341_s22 = sshll.u32 (!%p416_p9), %s1687_s17, 7 }
  0x18   : > { %v1492_v0 = vld [vmem:[%s1927_s1] sm:$0xff] (!%p416_p9)   ;;  %v1493_v3 = vld [vmem:[%s1927_s1 + $0x8] sm:$0xff] (!%p416_p9)  }
  0x19   : > { %1377 = vmatprep.mubr.msk.bf16.mxu0 (!%p416_p9), %vm529_vm0, %v1492_v0  ;;  %v1497_v0 = vld [vmem:[%s1907_s3 + $0x18] sm:$0xff] (!%p416_p9)  }
  0x1a   : > { %s462_s27 = scalar_select %p461_p10, %s1687_s17, 1 }
  0x1b   : > { %s1590_s17 = smov [#allocation2]  }
  0x1c   : > { %s1344_s28 = sshll.u32 %s462_s27, 4  ;;  %s458_s27 = sand.u32 1, %s1578_s30  }
  0x1d   : > { %s465_s21 = scalar_lea.vmem %s1928_s0, %s1344_s28  ;;  %s1304_s28 = sshll.u32 %s458_s27, 3 }
  0x1e   : > { %v1490_v1 = vld [vmem:[%s465_s21] sm:$0xff]   ;;  %v1491_v2 = vld [vmem:[%s465_s21 + $0x8] sm:$0xff]   ;;  %s460_s25 = scalar_lea.vmem [#allocation2], %s1304_s28  ;;  %s1228_s18 = scalar_lea.sflag [#allocation3], %s458_s27 }
  0x1f   : > { %1373 = vmatprep.subr.bf16.mxu0 %v1490_v1  ;;  %s1241_s26 = sshll.u32 %s460_s25, 4  ;;  %s1528_s28 = sshll.u32 %s1590_s17, 4  ;;  %s1863_s26 = int_to_ptr.vmem [resolvable:$true] %s1241_s26  ;;  %s1529_s28 = int_to_ptr.vmem [resolvable:$false] %s1528_s28 }
  0x20   : > { %1374 = vmatpush3.bf16.msra.mxu0 %v1490_v1  ;;  %s1524_s20 = scalar_lea.vmem %s1863_s26, 128  ;;  %s1530_s21 = scalar_lea.vmem %s1529_s28, 256 }
  0x21   : > { %1375 = vmatprep.subr.bf16.mxu0 %v1491_v2  ;;  %p1525_p11 = scmp.ne.s32.totalorder %s1863_s26, %s1524_s20  ;;  %p1531_p0 = scmp.lt.s32.totalorder %s1863_s26, %s1529_s28 }
  0x22   : > { %p1532_p1 = scmp.lt.s32.totalorder %s1530_s21, %s1524_s20 }
  0x23   : > { %p1526_p12 = pnand %p1525_p11, %p1704_p5 }
  0x24   : > { %1376 = vmatpush3.bf16.msra.mxu0 %v1491_v2  ;;  %p1533_p2 = por %p1532_p1, %p1531_p0 }
  0x25   : > { %1381 = vmatprep.subr.bf16.mxu0 %v1588_v28  ;;  %p1527_p13 = pneg %p1526_p12 }
  0x27   : > { %1378 = vmatmul.mubr.msk.bf16.vlgmr.msra.gmra.mrb[0].mxu0 %vm529_vm0, %v1493_v3  ;;  %v482_v3 = vld [vmem:[%s1908_s4 + $0x8] sm:$0xf]  ;;  %p1534_p3 = pnand %p1533_p2, %p1527_p13 }
  0x28   : > { %1382 = vmatpush3.bf16.msra.mxu0 %v1494_v27  ;;  %1383 = vmatprep.mubr.msk.bf16.mxu0 %vm1589_vm2, %v1588_v28 }
  0x29   : > { %1393 = vmatprep.subr.bf16.mxu0 %v1588_v28 }
  0xfa   : > { %v1379_v4 = vpop.f32.mrb[0].mxu0 }
  0xfb   : > { %v570_v5 = vpop.f32.mrb[1].mxu0  ;;  %v592_v10 = vsel %vm585_vm1, %v1379_v4, -inf }
  0xfc   : > { %v1380_v6 = vpop.f32.mrb[2].mxu0  ;;  %v586_v7 = vsel %vm585_vm1, %v570_v5, -inf }
  0xfd   : > { %587 = vmax.xlane.f32.xlu0 %v586_v7  ;;  %v573_v8 = vpop.f32.mrb[3].mxu0  ;;  %v595_v25 = vsel %vm585_vm1, %v1380_v6, -inf }
  0xfe   : > { %v589_v9 = vsel %vm585_vm1, %v573_v8, -inf }
 0x101   : > { %590 = vmax.xlane.f32.xlu0 %v589_v9 }
 0x105   : > { %593 = vmax.xlane.f32.xlu0 %v592_v10 }
 0x18a   : > { %v588_v11 = vpop.xlane.xlu0 %587 }
 0x18b   : > { %v598_v12 = vsub.f32 %v570_v5, %v588_v11 }
 0x18d   : > { %v602_v13 = vmul.f32 1.442695, %v598_v12 }
 0x18e   : > { %v591_v14 = vpop.xlane.xlu0 %590 }
 0x18f   : > { %1504 = vpow2.f32 %v602_v13  ;;  %v599_v15 = vsub.f32 %v573_v8, %v591_v14  ;;  %v483_v14 = vld [vmem:[%s1908_s4 + $0xc] sm:$0xf] }
 0x191   : > { %v604_v16 = vmul.f32 1.442695, %v599_v15 }
 0x192   : > { %v594_v17 = vpop.xlane.xlu0 %593 }
 0x193   : > { %1506 = vpow2.f32 %v604_v16  ;;  %v600_v18 = vsub.f32 %v1379_v4, %v594_v17  ;;  %v882_v4 = vsel %vm738_vm3, %v482_v3, 0 }
 0x195   : > { %v606_v19 = vmul.f32 1.442695, %v600_v18  ;;  %v981_v18 = vsel %vm738_vm3, %v483_v14, 0 }
 0x197   : > { %1508 = vpow2.f32 %v606_v19 }
 0x199   : > { %v1505_v20 = vpop.eup %1504 }
 0x19a   : > { %v610_v21 = vsel %vm585_vm1, %v1505_v20, 0.0 }
 0x19b   : > { %611 = vadd.xlane.f32.xlu1 %v610_v21 }
 0x19d   : > { %v1507_v22 = vpop.eup %1506 }
 0x19e   : > { %v613_v23 = vsel %vm585_vm1, %v1507_v22, 0.0 }
 0x19f   : > { %614 = vadd.xlane.f32.xlu1 %v613_v23 }
 0x1a1   : > { %v1732_v24 = vpop.eup %1508 }
 0x1a2   : > { %v616_v26 = vsel %vm585_vm1, %v1732_v24, 0.0 }
 0x1a3   : > { %596 = vmax.xlane.f32.xlu1 %v595_v25  ;;  %617 = vadd.xlane.f32.xlu0 %v616_v26 }
 0x228   : > { %v612_v30 = vpop.xlane.xlu1 %611 }
 0x229   : > { %1510 = vrcp.f32 %v612_v30 }
 0x22c   : > { %v615_v31 = vpop.xlane.xlu1 %614 }
 0x22d   : > { %1512 = vrcp.f32 %v615_v31 }
 0x230   : > { %v597_v32 = vpop.xlane.xlu1 %596  ;;  %v618_v48 = vpop.xlane.xlu0 %617 }
 0x231   : > { %v601_v33 = vsub.f32 %v1380_v6, %v597_v32  ;;  %v1325_v32 = vld [vmem:[%s1909_s5] ss:$0 sm:$0xff] }
 0x233   : > { %v608_v34 = vmul.f32 1.442695, %v601_v33  ;;  %v1511_v35 = vpop.eup %1510 }
 0x234   : > { %v626_v37 = vmul.f32 %v1511_v35, %v1505_v20 }
 0x235   : > { %1514 = vpow2.f32 %v608_v34 }
 0x237   : > { %v1513_v36 = vpop.eup %1512 }
 0x238   : > { %v627_v38 = vmul.f32 %v1513_v36, %v1507_v22 }
 0x23a   : > { %v630_v39 = vpack.c.bf16 %v627_v38, %v626_v37  ;;  %v471_v37 = vld [vmem:[%s1929_s2] sm:$0xff]  ;;  %s1861_s2 = scalar_lea.hbm %s1918_s14, %s1341_s22 }
 0x23c   : > { %1384 = vmatmul.mubr.msk.bf16.vlgmr.msra.gmra.mrb[4].mxu0 %vm585_vm1, %v630_v39  ;;  %v683_v40 = vrot.slane %v630_v39, 4 }
 0x23d   : > { %1395 = vmatprep.mubr.msk.bf16.mxu0 %vm1589_vm2, %v1588_v28  ;;  %1394 = vmatpush3.bf16.msra.mxu0 %v740_v44 }
 0x23e   : > { %1390 = vmatmul.mubr.msk.bf16.vlgmr.msra.gmra.mrb[0].mxu1 %vm585_vm1, %v683_v40  ;;  %1405 = vmatprep.subr.bf16.mxu0 %v1588_v28 }
 0x23f   : > { %v1515_v41 = vpop.eup %1514  ;;  %1401 = vmatprep.mubr.msk.bf16.mxu1 %vm1589_vm2, %v1588_v28  ;;  %1400 = vmatpush3.bf16.msra.mxu1 %v786_v46 }
 0x240   : > { %v619_v42 = vsel %vm585_vm1, %v1515_v41, 0.0  ;;  %1411 = vmatprep.subr.bf16.mxu1 %v1588_v28 }
 0x241   : > { %620 = vadd.xlane.f32.xlu1 %v619_v42 }
 0x2ce   : > { %v621_v47 = vpop.xlane.xlu1 %620 }
 0x2cf   : > { %1516 = vrcp.f32 %v621_v47  ;;  %v1498_v47 = vld [vmem:[%s1912_s8] sm:$0xff]  }
 0x2d0   : > { %1518 = vrcp.f32 %v618_v48  ;;  %v1499_v48 = vld [vmem:[%s1912_s8 + $0x8] sm:$0xff]  }
 0x2d9   : > { %v1517_v58 = vpop.eup %1516 }
 0x2da   : > { %v1519_v61 = vpop.eup %1518  ;;  %v629_v62 = vmul.f32 %v1517_v58, %v1515_v41 }
 0x2db   : > { %v628_v63 = vmul.f32 %v1519_v61, %v1732_v24  ;;  %v1502_v61 = vld [vmem:[%s1914_s10 + $0x10] sm:$0xff]  }
 0x2dd   : > { %v631_v1 = vpack.c.bf16 %v629_v62, %v628_v63  ;;  %v1503_v62 = vld [vmem:[%s1914_s10 + $0x18] sm:$0xff]   ;;  %v1328_v63 = vld [vmem:[%s1913_s9] ss:$0 sm:$0xff] }
 0x2df   : > { %v926_v2 = vrot.slane %v631_v1, 4 }
 0x30f   : > { %v675_v49 = vpop.f32.mrb[4].mxu0 }
 0x310   : > { %v681_v50 = vpack.c.bf16 %v675_v49, %v675_v49  ;;  %v1385_v51 = vpop.f32.mrb[5].mxu0  ;;  %v1500_v49 = vld [vmem:[%s1914_s10] sm:$0xff]  }
 0x311   : > { %v678_v52 = vpop.f32.mrb[6].mxu0  ;;  %v727_v53 = vpop.f32.mrb[0].mxu1 }
 0x312   : > { %v733_v55 = vpack.c.bf16 %v727_v53, %v727_v53  ;;  %v1386_v56 = vpop.f32.mrb[7].mxu0  ;;  %v1391_v57 = vpop.f32.mrb[1].mxu1  ;;  %1402 = vmatmul.mubr.msk.bf16.vlgmr.msra.gmra.mrb[4].mxu1 %vm734_vm4, %v681_v50  ;;  %v1501_v50 = vld [vmem:[%s1914_s10 + $0x8] sm:$0xff]  }
 0x313   : > { %v730_v59 = vpop.f32.mrb[2].mxu1  ;;  %1413 = vmatprep.mubr.msk.bf16.mxu1 %vm1589_vm2, %v1588_v28  ;;  %1412 = vmatpush3.bf16.msra.mxu1 %v882_v4  ;;  %v1327_v57 = vld [vmem:[%s1911_s7] ss:$0 sm:$0xff] }
 0x314   : > { %v1392_v60 = vpop.f32.mrb[3].mxu1  ;;  %1396 = vmatmul.mubr.msk.bf16.vlgmr.msra.gmra.mrb[8].mxu0 %vm734_vm4, %v733_v55  ;;  %1423 = vmatprep.subr.bf16.mxu1 %v1588_v28  ;;  %v1326_v55 = vld [vmem:[%s1910_s6] ss:$0 sm:$0xff] }
 0x315   : > { %1406 = vmatpush3.bf16.msra.mxu0 %v1496_v54  ;;  %1407 = vmatprep.mubr.msk.bf16.mxu0 %vm1589_vm2, %v1588_v28 }
 0x316   : > { %1417 = vmatprep.subr.bf16.mxu0 %v1588_v28 }
 0x31c   : > { %1408 = vmatmul.mubr.msk.bf16.vlgmr.msra.gmra.mrb[12].mxu0 %vm585_vm1, %v631_v1 }
 0x31d   : > { %1418 = vmatpush3.bf16.msra.mxu0 %v1497_v0  ;;  %1419 = vmatprep.mubr.msk.bf16.mxu0 %vm1589_vm2, %v1588_v28 }
 0x31e   : > { %1429 = vmatprep.subr.bf16.mxu0 %v1588_v28 }
 0x324   : > { %1420 = vmatmul.mubr.msk.bf16.vlgmr.msra.gmra.mrb[16].mxu0 %vm585_vm1, %v926_v2 }
 0x325   : > { %1433 = vmatprep.mubr.msk.bf16.mxu0 %vm1589_vm2, %v1588_v28  ;;  %1430 = vmatpush3.bf16.msra.mxu0 %v1498_v47 }
 0x326   : > { %1431 = vmatprep.subr.bf16.mxu0 %v1588_v28 }
 0x329   : > { %1432 = vmatpush3.bf16.msra.mxu0 %v1499_v48 }
 0x3e5   : > { %v822_v5 = vpop.f32.mrb[4].mxu1 }
 0x3e6   : > { %v1403_v6 = vpop.f32.mrb[5].mxu1 }
 0x3e7   : > { %v776_v7 = vpop.f32.mrb[8].mxu0  ;;  %v825_v8 = vpop.f32.mrb[6].mxu1 }
 0x3e8   : > { %v823_v9 = vadd.f32 %v822_v5, %v776_v7  ;;  %v1397_v10 = vpop.f32.mrb[9].mxu0  ;;  %v1404_v11 = vpop.f32.mrb[7].mxu1 }
 0x3e9   : > { %v779_v12 = vpop.f32.mrb[10].mxu0 }
 0x3ea   : > { %v1398_v13 = vpop.f32.mrb[11].mxu0 }
 0x3ef   : > { %v871_v15 = vpop.f32.mrb[12].mxu0 }
 0x3f0   : > { %v877_v16 = vpack.c.bf16 %v871_v15, %v871_v15  ;;  %v1409_v17 = vpop.f32.mrb[13].mxu0 }
 0x3f1   : > { %v874_v19 = vpop.f32.mrb[14].mxu0 }
 0x3f2   : > { %v1410_v20 = vpop.f32.mrb[15].mxu0  ;;  %1414 = vmatmul.mubr.msk.bf16.vlgmr.msra.gmra.mrb[8].mxu1 %vm734_vm4, %v877_v16 }
 0x3f3   : > { %1424 = vmatpush3.bf16.msra.mxu1 %v981_v18  ;;  %1425 = vmatprep.mubr.msk.bf16.mxu1 %vm1589_vm2, %v1588_v28 }
 0x3f4   : > { %1437 = vmatprep.subr.bf16.mxu1 %v1588_v28 }
 0x3f7   : > { %v970_v21 = vpop.f32.mrb[16].mxu0 }
 0x3f8   : > { %v976_v22 = vpack.c.bf16 %v970_v21, %v970_v21  ;;  %v1421_v23 = vpop.f32.mrb[17].mxu0 }
 0x3f9   : > { %v973_v24 = vpop.f32.mrb[18].mxu0  ;;  %v1338_v23 = vld [vmem:[%s1916_s12] ss:$0 sm:$0xff] }
 0x3fa   : > { %v1422_v25 = vpop.f32.mrb[19].mxu0  ;;  %1426 = vmatmul.mubr.msk.bf16.vlgmr.msra.gmra.mrb[12].mxu1 %vm734_vm4, %v976_v22 }
 0x3fb   : > { %1445 = vmatprep.mubr.msk.bf16.mxu1 %vm1589_vm2, %v1588_v28  ;;  %1438 = vmatpush3.bf16.msra.mxu1 %v1500_v49  ;;  %v1339_v25 = vld [vmem:[%s1917_s13] ss:$0 sm:$0xff] }
 0x3fc   : > { %1439 = vmatprep.subr.bf16.mxu1 %v1588_v28 }
 0x3ff   : > { %1440 = vmatpush3.bf16.msra.mxu1 %v1501_v50 }
 0x400   : > { %1441 = vmatprep.subr.bf16.mxu1 %v1588_v28 }
 0x403   : > { %1442 = vmatpush3.bf16.msra.mxu1 %v1502_v61 }
 0x404   : > { %1443 = vmatprep.subr.bf16.mxu1 %v1588_v28  ;;  %v1332_v28 = vld [vmem:[%s1915_s11] ss:$0 sm:$0xff] }
 0x407   : > { %1444 = vmatpush3.bf16.msra.mxu1 %v1503_v62 }
 0x4c5   : > { %v918_v26 = vpop.f32.mrb[8].mxu1 }
 0x4c6   : > { %v924_v27 = vadd.f32 %v918_v26, %v823_v9  ;;  %v1415_v29 = vpop.f32.mrb[9].mxu1 }
 0x4c7   : > { %v921_v30 = vpop.f32.mrb[10].mxu1 }
 0x4c8   : > { %v1416_v31 = vpop.f32.mrb[11].mxu1 }
 0x4cd   : > { %v1017_v33 = vpop.f32.mrb[12].mxu1 }
 0x4ce   : > { %v1023_v34 = vadd.f32 %v1017_v33, %v924_v27  ;;  %v1427_v35 = vpop.f32.mrb[13].mxu1 }
 0x4cf   : > { %v1020_v36 = vpop.f32.mrb[14].mxu1 }
 0x4d0   : > { %v1030_v38 = vadd.f32 %v1325_v32, %v1023_v34  ;;  %v1428_v39 = vpop.f32.mrb[15].mxu1 }
 0x4d2   : > { %v1031_v40 = vadd.f32 %v1030_v38, %v471_v37 }
 0x4d4   : > { %v1032_v41 = vsel %vm529_vm0, %v1031_v40, 0.0 }
 0x4d5   : > { %1033 = vadd.xlane.f32.xlu0 %v1032_v41 }
 0x562   : > { %v1034_v42 = vpop.xlane.xlu0 %1033 }
 0x563   : > { %v1036_v43 = vmul.f32 0.03125, %v1034_v42 }
 0x565   : > { %v1037_v44 = vsub.f32 %v1031_v40, %v1036_v43 }
 0x567   : > { %v1038_v45 = vmul.f32 %v1037_v44, %v1037_v44 }
 0x569   : > { %v1039_v46 = vsel %vm529_vm0, %v1038_v45, 0.0 }
 0x56a   : > { %1040 = vadd.xlane.f32.xlu1 %v1039_v46 }
 0x5f7   : > { %v1041_v51 = vpop.xlane.xlu1 %1040 }
 0x5f8   : > { %v1042_v52 = vmul.f32 0.03125, %v1041_v51 }
 0x5fa   : > { %v1043_v53 = vadd.f32 1e-05, %v1042_v52 }
 0x5fc   : > { %1520 = vrsqrt.f32 %v1043_v53 }
 0x606   : > { %v1521_v54 = vpop.eup %1520 }
 0x607   : > { %v1045_v56 = vmul.f32 %v1521_v54, %v1037_v44 }
 0x609   : > { %v1052_v58 = vmul.f32 %v1326_v55, %v1045_v56 }
 0x60b   : > { %v1059_v59 = vadd.f32 %v1327_v57, %v1052_v58 }
 0x60d   : > { %v1060_v60 = vpack.c.bf16 %v1059_v59, %v1059_v59 }
 0x60f   : > { %1434 = vmatmul.mubr.msk.bf16.vlgmr.msra.gmra.mrb[20].mxu0 %vm529_vm0, %v1060_v60 }
 0x6e2   : > { %v1116_v0 = vpop.f32.mrb[20].mxu0 }
 0x6e3   : > { %v1117_v1 = vadd.f32 %v1328_v63, %v1116_v0  ;;  %v1435_v2 = vpop.f32.mrb[21].mxu0 }
 0x6e4   : > { %v1119_v3 = vpop.f32.mrb[22].mxu0 }
 0x6e5   : > { %v1122_v4 = vmax.f32 %v1117_v1, 0.0  ;;  %v1436_v5 = vpop.f32.mrb[23].mxu0 }
 0x6e7   : > { %v1123_v6 = vpack.c.bf16 %v1122_v4, %v1122_v4 }
 0x6e9   : > { %1446 = vmatmul.mubr.msk.bf16.vlgmr.msra.gmra.mrb[16].mxu1 %vm1154_vm5, %v1123_v6 }
 0x7bc   : > { %v1192_v7 = vpop.f32.mrb[16].mxu1 }
 0x7bd   : > { %v1193_v8 = vadd.f32 %v1332_v28, %v1192_v7  ;;  %v1447_v9 = vpop.f32.mrb[17].mxu1 }
 0x7be   : > { %v1195_v10 = vpop.f32.mrb[18].mxu1 }
 0x7bf   : > { %v1448_v11 = vpop.f32.mrb[19].mxu1  ;;  %v1198_v12 = vadd.f32 %v1193_v8, %v1059_v59 }
 0x7c1   : > { %v1199_v13 = vsel %vm529_vm0, %v1198_v12, 0.0 }
 0x7c2   : > { %1200 = vadd.xlane.f32.xlu0 %v1199_v13 }
 0x84f   : > { %v1201_v14 = vpop.xlane.xlu0 %1200 }
 0x850   : > { %v1202_v15 = vmul.f32 0.03125, %v1201_v14 }
 0x852   : > { %v1203_v16 = vsub.f32 %v1198_v12, %v1202_v15 }
 0x854   : > { %v1204_v17 = vmul.f32 %v1203_v16, %v1203_v16 }
 0x856   : > { %v1205_v18 = vsel %vm529_vm0, %v1204_v17, 0.0 }
 0x857   : > { %1206 = vadd.xlane.f32.xlu1 %v1205_v18 }
 0x8e4   : > { %v1207_v19 = vpop.xlane.xlu1 %1206 }
 0x8e5   : > { %v1208_v20 = vmul.f32 0.03125, %v1207_v19 }
 0x8e7   : > { %v1209_v21 = vadd.f32 1e-05, %v1208_v20 }
 0x8e9   : > { %1522 = vrsqrt.f32 %v1209_v21 }
 0x8f3   : > { %v1523_v22 = vpop.eup %1522 }
 0x8f4   : > { %v1211_v24 = vmul.f32 %v1523_v22, %v1203_v16 }
 0x8f6   : > { %v1218_v26 = vmul.f32 %v1338_v23, %v1211_v24 }
 0x8f8   : > { %v1225_v27 = vadd.f32 %v1339_v25, %v1218_v26 }
 0x8fa   : > { %1226 = vst.msk [vmem:[%s460_s25] sm:$0xff] %vm529_vm0, %v1225_v27 }
 0x8fb   : > { %1537 = shalt.err (!%p1534_p3)
}
 0x8fc   : > { %s1538_s0 = scalar_lea.hbm %s1861_s2, 128  ;;  %s1542_s15 = scalar_lea.hbm %s1918_s14, 256 }
 0x8fd   : > { %p1539_p4 = scmp.ne.s32.totalorder %s1861_s2, %s1538_s0  ;;  %p1543_p9 = scmp.lt.u32.totalorder %s1861_s2, %s1918_s14 }
 0x8fe   : > { %p1544_p10 = scmp.lt.u32.totalorder %s1542_s15, %s1538_s0  ;;  %p1546_p12 = scmp.lt.u32.totalorder %s1538_s0, %s1861_s2 }
 0x8ff   : > { %p1540_p7 = pnand %p1539_p4, %p1704_p5 }
 0x900   : > { %p1545_p11 = por %p1544_p10, %p1543_p9 }
 0x901   : > { %p1541_p8 = pneg %p1540_p7 }
 0x902   : > { %p1547_p13 = por %p1546_p12, %p1545_p11 }
 0x904   : > { %p1548_p0 = pnand %p1547_p13, %p1541_p8 }
 0x906   : > { %1551 = shalt.err (!%p1548_p0)
}
 0x907   : > { %1449 = dma.vmem_to_hbm [thread:$0]  (%p1704_p5), %s1863_s26, 128, %s1861_s2, %s1228_s18  }
 0x908 PF: > { %p1455_p1 = scmp.ge.s32.totalorder %s1586_s16, 2  ;;  %s1253_s20 = sand.u32 1, %s1574_s29  }
 0x909   : > { %s1254_s17 = scalar_lea.sflag [#allocation3], %s1253_s20 }
 0x90a   : > { %p1452_p2 = pnand %p1455_p1, %p1708_p6 }
 0x90c   : > { %1569 = dma.done.wait (!%p1452_p2), %s1254_s17, 128  }
 0x90d   : > { %1571 = vsyncadd (!%p1452_p2), %s1254_s17, 4294967168  ;;  %s1930_s28 = sld [smem:[#allocation5_spill]]  ;;  %s1931_s15 = sld [smem:[#allocation6_spill]] }
 0x90e   : > { %p24_p3 = scmp.ge.s32.totalorder %s1691_s19, 4   ;;  %s1932_s29 = smov %s1578_s30 }
 0x90f   : > { %s1934_s16 = smov %s1691_s19 }
 0x910   :  { %26 = sbr.rel (!%p24_p3) target bundleno = 7 (0x7), region = 111 }
 0x913   : > { %s1933_s30 = smov %s1930_s28 }
 0x917   :  { %1259 = vsyncpa [#allocation3], 1 }
 0x918   :  { %1261 = vsyncpa [#allocation3 + $0x1], 1 }

</bundles_post_ra>
